<compile_context>
chip_gen: v6e
topology: v6e:2x2x1
jax: 0.10.0
libtpu: 0.0.40
codegen_flags: <defaults>
</compile_context>

<pallas_src>
import functools

import numpy as np
import jax
import jax.numpy as jnp
from jax.experimental import pallas as pl
from jax.experimental.pallas import tpu as pltpu


def _gaussian_kernel1d_np(kernel_size: int, sigma: float) -> np.ndarray:
    """Matches torchvision _get_gaussian_kernel1d (computed on host in numpy)."""
    ksize_half = (kernel_size - 1) * 0.5
    x = np.linspace(-ksize_half, ksize_half, kernel_size, dtype=np.float32)
    pdf = np.exp(-0.5 * (x / np.float32(sigma)) ** 2).astype(np.float32)
    return (pdf / pdf.sum()).astype(np.float32)


def _choose_channels_per_block(nc, h, w, ky, kx, budget_bytes=8 << 20):
    """Largest divisor of nc whose f32 block working set fits the VMEM budget,
    preferring a grid of >= 2 steps so the parallel axis can use both TCs."""
    hp, wp = h + ky - 1, w + kx - 1
    # 2x double-buffered input + 2x double-buffered output + padded scratch + row scratch
    per_c = 4 * (2 * h * w + 2 * h * w + hp * wp + hp * w)
    max_tc = max(1, budget_bytes // per_c)
    divisors = [d for d in range(1, nc + 1) if nc % d == 0 and d <= max_tc]
    if not divisors:
        return 1
    pref = [d for d in divisors if nc // d >= 2]
    return max(pref) if pref else max(divisors)


def _blur_kernel(x_ref, o_ref, xp_ref, row_ref, *, H, W, Ky, Kx, wx, wy):
    """x_ref / o_ref: (TC, H, W).
    xp_ref : (TC, H + Ky - 1, W + Kx - 1) f32 scratch — reflect-padded copy.
    row_ref: (TC, H + Ky - 1, W)          f32 scratch — row-pass result.
    wx, wy : Python float tuples (baked constants), applied along W and H."""
    px, py = Kx // 2, Ky // 2

    x = x_ref[...].astype(jnp.float32)

    # ---- in-kernel reflect padding into VMEM scratch (no HBM pad round trip) ----
    # centre block
    xp_ref[:, py:py + H, px:px + W] = x
    # reflect along W (columns) for the centre rows
    for k in range(px):
        xp_ref[:, py:py + H, k:k + 1] = x[:, :, px - k:px - k + 1]
        xp_ref[:, py:py + H, px + W + k:px + W + k + 1] = x[:, :, W - 2 - k:W - 1 - k]
    # reflect along H (rows): copy already-W-padded rows (also fills corners)
    for k in range(py):
        xp_ref[:, k:k + 1, :] = xp_ref[:, 2 * py - k:2 * py - k + 1, :]
        xp_ref[:, py + H + k:py + H + k + 1, :] = xp_ref[:, py + H - 2 - k:py + H - 1 - k, :]

    # ---- separable pass 1: along W (lane axis), scalar-constant taps ----
    acc = wx[0] * xp_ref[:, :, 0:W]
    for t in range(1, Kx):
        acc = acc + wx[t] * xp_ref[:, :, t:t + W]
    row_ref[...] = acc

    # ---- separable pass 2: along H (sublane axis) ----
    out = wy[0] * row_ref[:, 0:H, :]
    for t in range(1, Ky):
        out = out + wy[t] * row_ref[:, t:t + H, :]
    o_ref[...] = out.astype(o_ref.dtype)


def gaussian_blur_pallas(img: jnp.ndarray, kernel_size, sigma) -> jnp.ndarray:
    """img: float NCHW tensor. kernel_size = (kx, ky), sigma = (sigma_x, sigma_y)."""
    assert img.ndim == 4, "expect NCHW"
    N, C, H, W = img.shape
    kx, ky = int(kernel_size[0]), int(kernel_size[1])
    px, py = kx // 2, ky // 2
    assert px < W and py < H, "reflect padding requires kernel_size // 2 < spatial size"

    # Baked scalar taps (sigma is a concrete host float, like torch's .item()).
    wx = tuple(float(v) for v in _gaussian_kernel1d_np(kx, float(sigma[0])))  # along W
    wy = tuple(float(v) for v in _gaussian_kernel1d_np(ky, float(sigma[1])))  # along H

    NC = N * C
    x = img.reshape(NC, H, W)
    TC = _choose_channels_per_block(NC, H, W, ky, kx)
    G = NC // TC
    Hp, Wp = H + 2 * py, W + 2 * px

    kernel_fn = functools.partial(
        _blur_kernel, H=H, W=W, Ky=ky, Kx=kx, wx=wx, wy=wy
    )

    out = pl.pallas_call(
        kernel_fn,
        out_shape=jax.ShapeDtypeStruct((NC, H, W), img.dtype),
        grid_spec=pltpu.PrefetchScalarGridSpec(
            num_scalar_prefetch=0,
            grid=(G,),
            in_specs=[pl.BlockSpec((TC, H, W), lambda g: (g, 0, 0))],
            out_specs=pl.BlockSpec((TC, H, W), lambda g: (g, 0, 0)),
            scratch_shapes=[
                pltpu.VMEM((TC, Hp, Wp), jnp.float32),
                pltpu.VMEM((TC, Hp, W), jnp.float32),
            ],
        ),
        compiler_params=pltpu.CompilerParams(
            dimension_semantics=("parallel",),
            vmem_limit_bytes=32 * 1024 * 1024,
        ),
    )(x)
    return out.reshape(N, C, H, W)


def gaussian_blur_ref(img, kernel_size, sigma):
    """Pure-JAX direct (non-separable) reference for the correctness check."""
    N, C, H, W = img.shape
    kx, ky = int(kernel_size[0]), int(kernel_size[1])
    k1x = _gaussian_kernel1d_np(kx, float(sigma[0]))
    k1y = _gaussian_kernel1d_np(ky, float(sigma[1]))
    w = jnp.asarray(k1y[:, None] * k1x[None, :])  # (ky, kx)
    px, py = kx // 2, ky // 2
    img_p = jnp.pad(img, ((0, 0), (0, 0), (py, py), (px, px)), mode="reflect")
    acc = jnp.zeros(img.shape, jnp.float32)
    for i in range(ky):
        for j in range(kx):
            acc = acc + w[i, j] * img_p[:, :, i:i + H, j:j + W].astype(jnp.float32)
    return acc.astype(img.dtype)


class GaussianBlurPallas:
    """Mirrors torchvision's GaussianBlur module (kernel_size, sigma range)."""

    def __init__(self, kernel_size, sigma=(0.1, 2.0)):
        if isinstance(kernel_size, int):
            kernel_size = (kernel_size, kernel_size)
        self.kernel_size = tuple(int(k) for k in kernel_size)
        for ks in self.kernel_size:
            if ks <= 0 or ks % 2 == 0:
                raise ValueError("Kernel size should be odd and positive.")
        if isinstance(sigma, (int, float)):
            sigma = (float(sigma), float(sigma))
        self.sigma = sigma

    def __call__(self, img, key):
        # get_params: uniform sigma in [sigma_min, sigma_max]; drawn deterministically
        # from the provided PRNG key instead of torch RNG (host sync is intentional,
        # matching torch's .item() semantics).
        sigma = float(
            jax.random.uniform(key, (), minval=self.sigma[0], maxval=self.sigma[1])
        )
        return gaussian_blur_pallas(img, self.kernel_size, (sigma, sigma))


if __name__ == "__main__":
    key = jax.random.PRNGKey(0)
    k_img, k_sigma = jax.random.split(key)

    # Small NCHW image: batch=2, channels=4, spatial=16x16.
    x = jax.random.normal(k_img, (2, 4, 16, 16), dtype=jnp.float32)

    blur = GaussianBlurPallas(kernel_size=5, sigma=(0.1, 2.0))
    out = blur(x, k_sigma)
    out = jax.block_until_ready(out)

    # Verify against the pure-JAX reference with the same (deterministic) sigma.
    sigma = float(jax.random.uniform(k_sigma, (), minval=0.1, maxval=2.0))
    ref = jax.block_until_ready(gaussian_blur_ref(x, (5, 5), (sigma, sigma)))
    np.testing.assert_allclose(np.asarray(out), np.asarray(ref), rtol=1e-5, atol=1e-5)

    print("KERNEL_OK")
</pallas_src>

<mosaic_0001>
module attributes {stable_mosaic.version = 11 : i64} {
  func.func @_blur_kernel(%arg0: i32, %arg1: memref<4x16x16xf32, #tpu.memory_space<vmem>>, %arg2: memref<4x16x16xf32, #tpu.memory_space<vmem>>, %arg3: memref<4x20x20xf32, #tpu.memory_space<vmem>>, %arg4: memref<4x20x16xf32, #tpu.memory_space<vmem>>) attributes {dimension_semantics = [#tpu.dimension_semantics<parallel>], iteration_bounds = array<i64: 2>, scalar_prefetch = 0 : i64, scratch_operands = 2 : i64, tpu.core_type = #tpu.core_type<tc>, window_params = [{transform_indices = @transform_0, window_bounds = array<i64: 4, 16, 16>}, {transform_indices = @transform_1, window_bounds = array<i64: 4, 16, 16>}]} {
    %c0 = arith.constant 0 : index
    %c0_0 = arith.constant 0 : index
    %c0_1 = arith.constant 0 : index
    %0 = vector.load %arg1[%c0, %c0_0, %c0_1] : memref<4x16x16xf32, #tpu.memory_space<vmem>>, vector<4x16x16xf32>
    %c0_2 = arith.constant 0 : index
    %c2 = arith.constant 2 : index
    %c2_3 = arith.constant 2 : index
    %1 = vector.load %arg3[%c0_2, %c2, %c2_3] : memref<4x20x20xf32, #tpu.memory_space<vmem>>, vector<4x16x16xf32>
    tpu.vector_store %arg3[%c0_2, %c2, %c2_3], %0 {strides = array<i32>} : memref<4x20x20xf32, #tpu.memory_space<vmem>>, vector<4x16x16xf32>,
    %2 = vector.extract_strided_slice %0 {offsets = [0, 0, 2], sizes = [4, 16, 1], strides = [1, 1, 1]} : vector<4x16x16xf32> to vector<4x16x1xf32>
    %c0_4 = arith.constant 0 : index
    %c2_5 = arith.constant 2 : index
    %c0_6 = arith.constant 0 : index
    %3 = vector.load %arg3[%c0_4, %c2_5, %c0_6] : memref<4x20x20xf32, #tpu.memory_space<vmem>>, vector<4x16x1xf32>
    tpu.vector_store %arg3[%c0_4, %c2_5, %c0_6], %2 {strides = array<i32>} : memref<4x20x20xf32, #tpu.memory_space<vmem>>, vector<4x16x1xf32>,
    %4 = vector.extract_strided_slice %0 {offsets = [0, 0, 14], sizes = [4, 16, 1], strides = [1, 1, 1]} : vector<4x16x16xf32> to vector<4x16x1xf32>
    %c0_7 = arith.constant 0 : index
    %c2_8 = arith.constant 2 : index
    %c18 = arith.constant 18 : index
    %5 = vector.load %arg3[%c0_7, %c2_8, %c18] : memref<4x20x20xf32, #tpu.memory_space<vmem>>, vector<4x16x1xf32>
    tpu.vector_store %arg3[%c0_7, %c2_8, %c18], %4 {strides = array<i32>} : memref<4x20x20xf32, #tpu.memory_space<vmem>>, vector<4x16x1xf32>,
    %6 = vector.extract_strided_slice %0 {offsets = [0, 0, 1], sizes = [4, 16, 1], strides = [1, 1, 1]} : vector<4x16x16xf32> to vector<4x16x1xf32>
    %c0_9 = arith.constant 0 : index
    %c2_10 = arith.constant 2 : index
    %c1 = arith.constant 1 : index
    %7 = vector.load %arg3[%c0_9, %c2_10, %c1] : memref<4x20x20xf32, #tpu.memory_space<vmem>>, vector<4x16x1xf32>
    tpu.vector_store %arg3[%c0_9, %c2_10, %c1], %6 {strides = array<i32>} : memref<4x20x20xf32, #tpu.memory_space<vmem>>, vector<4x16x1xf32>,
    %8 = vector.extract_strided_slice %0 {offsets = [0, 0, 13], sizes = [4, 16, 1], strides = [1, 1, 1]} : vector<4x16x16xf32> to vector<4x16x1xf32>
    %c0_11 = arith.constant 0 : index
    %c2_12 = arith.constant 2 : index
    %c19 = arith.constant 19 : index
    %9 = vector.load %arg3[%c0_11, %c2_12, %c19] : memref<4x20x20xf32, #tpu.memory_space<vmem>>, vector<4x16x1xf32>
    tpu.vector_store %arg3[%c0_11, %c2_12, %c19], %8 {strides = array<i32>} : memref<4x20x20xf32, #tpu.memory_space<vmem>>, vector<4x16x1xf32>,
    %c0_13 = arith.constant 0 : index
    %c4 = arith.constant 4 : index
    %c0_14 = arith.constant 0 : index
    %10 = vector.load %arg3[%c0_13, %c4, %c0_14] : memref<4x20x20xf32, #tpu.memory_space<vmem>>, vector<4x1x20xf32>
    %c0_15 = arith.constant 0 : index
    %c0_16 = arith.constant 0 : index
    %c0_17 = arith.constant 0 : index
    %11 = vector.load %arg3[%c0_15, %c0_16, %c0_17] : memref<4x20x20xf32, #tpu.memory_space<vmem>>, vector<4x1x20xf32>
    tpu.vector_store %arg3[%c0_15, %c0_16, %c0_17], %10 {strides = array<i32>} : memref<4x20x20xf32, #tpu.memory_space<vmem>>, vector<4x1x20xf32>,
    %c0_18 = arith.constant 0 : index
    %c16 = arith.constant 16 : index
    %c0_19 = arith.constant 0 : index
    %12 = vector.load %arg3[%c0_18, %c16, %c0_19] : memref<4x20x20xf32, #tpu.memory_space<vmem>>, vector<4x1x20xf32>
    %c0_20 = arith.constant 0 : index
    %c18_21 = arith.constant 18 : index
    %c0_22 = arith.constant 0 : index
    %13 = vector.load %arg3[%c0_20, %c18_21, %c0_22] : memref<4x20x20xf32, #tpu.memory_space<vmem>>, vector<4x1x20xf32>
    tpu.vector_store %arg3[%c0_20, %c18_21, %c0_22], %12 {strides = array<i32>} : memref<4x20x20xf32, #tpu.memory_space<vmem>>, vector<4x1x20xf32>,
    %c0_23 = arith.constant 0 : index
    %c3 = arith.constant 3 : index
    %c0_24 = arith.constant 0 : index
    %14 = vector.load %arg3[%c0_23, %c3, %c0_24] : memref<4x20x20xf32, #tpu.memory_space<vmem>>, vector<4x1x20xf32>
    %c0_25 = arith.constant 0 : index
    %c1_26 = arith.constant 1 : index
    %c0_27 = arith.constant 0 : index
    %15 = vector.load %arg3[%c0_25, %c1_26, %c0_27] : memref<4x20x20xf32, #tpu.memory_space<vmem>>, vector<4x1x20xf32>
    tpu.vector_store %arg3[%c0_25, %c1_26, %c0_27], %14 {strides = array<i32>} : memref<4x20x20xf32, #tpu.memory_space<vmem>>, vector<4x1x20xf32>,
    %c0_28 = arith.constant 0 : index
    %c15 = arith.constant 15 : index
    %c0_29 = arith.constant 0 : index
    %16 = vector.load %arg3[%c0_28, %c15, %c0_29] : memref<4x20x20xf32, #tpu.memory_space<vmem>>, vector<4x1x20xf32>
    %c0_30 = arith.constant 0 : index
    %c19_31 = arith.constant 19 : index
    %c0_32 = arith.constant 0 : index
    %17 = vector.load %arg3[%c0_30, %c19_31, %c0_32] : memref<4x20x20xf32, #tpu.memory_space<vmem>>, vector<4x1x20xf32>
    tpu.vector_store %arg3[%c0_30, %c19_31, %c0_32], %16 {strides = array<i32>} : memref<4x20x20xf32, #tpu.memory_space<vmem>>, vector<4x1x20xf32>,
    %c0_33 = arith.constant 0 : index
    %c0_34 = arith.constant 0 : index
    %c0_35 = arith.constant 0 : index
    %18 = vector.load %arg3[%c0_33, %c0_34, %c0_35] : memref<4x20x20xf32, #tpu.memory_space<vmem>>, vector<4x20x16xf32>
    %cst = arith.constant 0.000000e+00 : f32
    %19 = vector.broadcast %cst : f32 to vector<4x20x16xf32>
    %20 = arith.mulf %19, %18 : vector<4x20x16xf32>
    %c0_36 = arith.constant 0 : index
    %c0_37 = arith.constant 0 : index
    %c1_38 = arith.constant 1 : index
    %21 = vector.load %arg3[%c0_36, %c0_37, %c1_38] : memref<4x20x20xf32, #tpu.memory_space<vmem>>, vector<4x20x16xf32>
    %cst_39 = arith.constant 1.77662861E-17 : f32
    %22 = vector.broadcast %cst_39 : f32 to vector<4x20x16xf32>
    %23 = arith.mulf %22, %21 : vector<4x20x16xf32>
    %24 = arith.addf %20, %23 : vector<4x20x16xf32>
    %c0_40 = arith.constant 0 : index
    %c0_41 = arith.constant 0 : index
    %c2_42 = arith.constant 2 : index
    %25 = vector.load %arg3[%c0_40, %c0_41, %c2_42] : memref<4x20x20xf32, #tpu.memory_space<vmem>>, vector<4x20x16xf32>
    %cst_43 = arith.constant 1.000000e+00 : f32
    %26 = vector.broadcast %cst_43 : f32 to vector<4x20x16xf32>
    %27 = arith.mulf %26, %25 : vector<4x20x16xf32>
    %28 = arith.addf %24, %27 : vector<4x20x16xf32>
    %c0_44 = arith.constant 0 : index
    %c0_45 = arith.constant 0 : index
    %c3_46 = arith.constant 3 : index
    %29 = vector.load %arg3[%c0_44, %c0_45, %c3_46] : memref<4x20x20xf32, #tpu.memory_space<vmem>>, vector<4x20x16xf32>
    %cst_47 = arith.constant 1.77662861E-17 : f32
    %30 = vector.broadcast %cst_47 : f32 to vector<4x20x16xf32>
    %31 = arith.mulf %30, %29 : vector<4x20x16xf32>
    %32 = arith.addf %28, %31 : vector<4x20x16xf32>
    %c0_48 = arith.constant 0 : index
    %c0_49 = arith.constant 0 : index
    %c4_50 = arith.constant 4 : index
    %33 = vector.load %arg3[%c0_48, %c0_49, %c4_50] : memref<4x20x20xf32, #tpu.memory_space<vmem>>, vector<4x20x16xf32>
    %cst_51 = arith.constant 0.000000e+00 : f32
    %34 = vector.broadcast %cst_51 : f32 to vector<4x20x16xf32>
    %35 = arith.mulf %34, %33 : vector<4x20x16xf32>
    %36 = arith.addf %32, %35 : vector<4x20x16xf32>
    %c0_52 = arith.constant 0 : index
    %c0_53 = arith.constant 0 : index
    %c0_54 = arith.constant 0 : index
    %37 = vector.load %arg4[%c0_52, %c0_53, %c0_54] : memref<4x20x16xf32, #tpu.memory_space<vmem>>, vector<4x20x16xf32>
    tpu.vector_store %arg4[%c0_52, %c0_53, %c0_54], %36 {strides = array<i32>} : memref<4x20x16xf32, #tpu.memory_space<vmem>>, vector<4x20x16xf32>,
    %c0_55 = arith.constant 0 : index
    %c0_56 = arith.constant 0 : index
    %c0_57 = arith.constant 0 : index
    %38 = vector.load %arg4[%c0_55, %c0_56, %c0_57] : memref<4x20x16xf32, #tpu.memory_space<vmem>>, vector<4x16x16xf32>
    %cst_58 = arith.constant 0.000000e+00 : f32
    %39 = vector.broadcast %cst_58 : f32 to vector<4x16x16xf32>
    %40 = arith.mulf %39, %38 : vector<4x16x16xf32>
    %c0_59 = arith.constant 0 : index
    %c1_60 = arith.constant 1 : index
    %c0_61 = arith.constant 0 : index
    %41 = vector.load %arg4[%c0_59, %c1_60, %c0_61] : memref<4x20x16xf32, #tpu.memory_space<vmem>>, vector<4x16x16xf32>
    %cst_62 = arith.constant 1.77662861E-17 : f32
    %42 = vector.broadcast %cst_62 : f32 to vector<4x16x16xf32>
    %43 = arith.mulf %42, %41 : vector<4x16x16xf32>
    %44 = arith.addf %40, %43 : vector<4x16x16xf32>
    %c0_63 = arith.constant 0 : index
    %c2_64 = arith.constant 2 : index
    %c0_65 = arith.constant 0 : index
    %45 = vector.load %arg4[%c0_63, %c2_64, %c0_65] : memref<4x20x16xf32, #tpu.memory_space<vmem>>, vector<4x16x16xf32>
    %cst_66 = arith.constant 1.000000e+00 : f32
    %46 = vector.broadcast %cst_66 : f32 to vector<4x16x16xf32>
    %47 = arith.mulf %46, %45 : vector<4x16x16xf32>
    %48 = arith.addf %44, %47 : vector<4x16x16xf32>
    %c0_67 = arith.constant 0 : index
    %c3_68 = arith.constant 3 : index
    %c0_69 = arith.constant 0 : index
    %49 = vector.load %arg4[%c0_67, %c3_68, %c0_69] : memref<4x20x16xf32, #tpu.memory_space<vmem>>, vector<4x16x16xf32>
    %cst_70 = arith.constant 1.77662861E-17 : f32
    %50 = vector.broadcast %cst_70 : f32 to vector<4x16x16xf32>
    %51 = arith.mulf %50, %49 : vector<4x16x16xf32>
    %52 = arith.addf %48, %51 : vector<4x16x16xf32>
    %c0_71 = arith.constant 0 : index
    %c4_72 = arith.constant 4 : index
    %c0_73 = arith.constant 0 : index
    %53 = vector.load %arg4[%c0_71, %c4_72, %c0_73] : memref<4x20x16xf32, #tpu.memory_space<vmem>>, vector<4x16x16xf32>
    %cst_74 = arith.constant 0.000000e+00 : f32
    %54 = vector.broadcast %cst_74 : f32 to vector<4x16x16xf32>
    %55 = arith.mulf %54, %53 : vector<4x16x16xf32>
    %56 = arith.addf %52, %55 : vector<4x16x16xf32>
    %c0_75 = arith.constant 0 : index
    %c0_76 = arith.constant 0 : index
    %c0_77 = arith.constant 0 : index
    %57 = vector.load %arg2[%c0_75, %c0_76, %c0_77] : memref<4x16x16xf32, #tpu.memory_space<vmem>>, vector<4x16x16xf32>
    tpu.vector_store %arg2[%c0_75, %c0_76, %c0_77], %56 {strides = array<i32>} : memref<4x16x16xf32, #tpu.memory_space<vmem>>, vector<4x16x16xf32>,
    return
  }
  func.func @transform_0(%arg0: i32) -> (i32, i32, i32) {
    %c0_i32 = arith.constant 0 : i32
    %c0_i32_0 = arith.constant 0 : i32
    %c0_i32_1 = arith.constant 0 : i32
    return %arg0, %c0_i32, %c0_i32_0 : i32, i32, i32
  }
  func.func @transform_1(%arg0: i32) -> (i32, i32, i32) {
    %c0_i32 = arith.constant 0 : i32
    %c0_i32_0 = arith.constant 0 : i32
    %c0_i32_1 = arith.constant 0 : i32
    return %arg0, %c0_i32, %c0_i32_0 : i32, i32, i32
  }
}

</mosaic_0001>

<bundles_post_ra>
// kernel: tpu_custom_call.1
= control target key start
LH: loop header
LB: loop body
LE: loop exit
PB: predicated region body
PF: predicated region fallthrough
CT: control target
= control target key end

     0   :  { %6 = vsyncpa [#allocation5], 0  ;;  %s1419_s0 = inlined_call_operand.hbm [shape: f32[8,16,16], index: 0, kind: input, shape index: {}]   ;;  %s1420_s1 = inlined_call_operand.hbm [shape: f32[8,16,16], index: 1, kind: output, shape index: {}]  }
   0x1   :  { %8 = vsyncpa [#allocation5 + $0x1], 0 }
   0x2   :  { %9 = vsyncpa [#allocation6], 0 }
   0x3   :  { %11 = vsyncpa [#allocation6 + $0x1], 0  ;;  %s1000_s6 = smov 0   ;;  %s1002_s7 = smov 0  }
   0x4   :  { %s1004_s8 = smov 0   ;;  %s1006_s9 = smov 0  }
   0x5 LB: > { %s1021_s10 = sadd.s32 4294967295, %s975_s9   ;;  %s806_s11 = sadd.s32 4294967294, %s975_s9   ;;  %s975_s9 = sphi %s1006_s9, %s1435_s9   ;;  %s971_s8 = sphi %s1004_s8, %s1434_s8   ;;  %s967_s7 = sphi %s1002_s7, %s1433_s7   ;;  %s963_s6 = sphi %s1000_s6, %s1432_s6  }
   0x6   : > { %s1025_s12 = sadd.s32 1, %s975_s9   ;;  %s24_s13 = sadd.s32 1, %s971_s8 }
   0x7   : > { %s21_s14 = ssub.s32 %s975_s9, %s1025_s12  ;;  %p31_p0 = scmp.ne.s32.totalorder %s971_s8, %s967_s7 }
   0x8   : > { %p22_p1 = scmp.eq.s32.totalorder %s21_s14, 0  ;;  %p32_p2 = scmp.eq.s32.totalorder %s975_s9, 0 }
   0x9   : > { %p37_p3 = scmp.ne.s32.totalorder %s967_s7, %s963_s6  ;;  %p38_p4 = scmp.eq.s32.totalorder %s1021_s10, 0 }
   0xa   : > { %s1037_s15 = scalar_select %p22_p1, %s971_s8, %s24_s13  }
   0xb   : > { %p1039_p5 = por %p32_p2, %p31_p0  ;;  %p1043_p6 = por %p38_p4, %p37_p3 }
   0xc   : > { %p61_p7 = scmp.eq.s32.totalorder %s1021_s10, 1  ;;  %p67_p8 = scmp.eq.s32.totalorder %s806_s11, 1 }
   0xd   : > { %s1424_s17 = scalar_select %p1043_p6, 1, 0 }
   0xe   : > { %p838_p10 = scmp.lt.s32.totalorder %s975_s9, 2  ;;  %p1050_p11 = por %p61_p7, %p31_p0 }
   0xf   : > { %p1054_p12 = por %p67_p8, %p37_p3  ;;  %s87_s20 = sand.u32 1, %s971_s8  }
  0x10   : > { %s1425_s18 = scalar_select %p1050_p11, 1, 0 }
  0x11   : > { %s1426_s19 = scalar_select %p1054_p12, 1, 0 }
  0x12   : > { %s823_s21 = sshll.u32 %s975_s9, 10  ;;  %s809_s22 = sshll.u32 %s87_s20, 6 }
  0x13   : > { %s1063_s25 = scalar_lea.hbm %s1419_s0, %s823_s21  ;;  %s91_s26 = scalar_lea.vmem [#allocation4], %s809_s22 }
  0x14   : > { %s99_s27 = sshll.u32 %s91_s26, 4  ;;  %p1067_p13 = pnand %p838_p10, %p1039_p5  ;;  %s1071_s27 = int_to_ptr.vmem [resolvable:$true] %s99_s27 }
  0x15   : > { %s1073_s29 = scalar_lea.sflag [#allocation5], %s87_s20  ;;  %s883_s30 = scalar_lea.hbm %s1063_s25, 1024 }
  0x16   : > { %p884_p0 = scmp.ne.s32.totalorder %s1063_s25, %s883_s30  ;;  %p885_p1 = pneg %p1067_p13 }
  0x17   : > { %s888_s4 = scalar_lea.hbm %s1419_s0, 2048  ;;  %p889_p4 = scmp.lt.s32.totalorder %s1063_s25, %s1419_s0 }
  0x18   : > { %p886_p2 = pnand %p885_p1, %p884_p0  ;;  %p890_p5 = scmp.lt.s32.totalorder %s888_s4, %s883_s30 }
  0x1a   : > { %p887_p3 = pneg %p886_p2  ;;  %p891_p7 = por %p890_p5, %p889_p4 }
  0x1c   : > { %p892_p8 = pnand %p891_p7, %p887_p3 }
  0x1e   : > { %895 = shalt.err (!%p892_p8)
}
  0x1f   : > { %s896_s13 = scalar_lea.vmem %s1071_s27, 1024  ;;  %s977_s14 = smov [#allocation4]  }
  0x20   : > { %p897_p10 = scmp.ne.s32.totalorder %s1071_s27, %s896_s13  ;;  %s901_s16 = sshll.u32 %s977_s14, 4  ;;  %s902_s16 = int_to_ptr.vmem [resolvable:$false] %s901_s16 }
  0x21   : > { %s903_s20 = scalar_lea.vmem %s902_s16, 2048  ;;  %p904_p2 = scmp.lt.s32.totalorder %s1071_s27, %s902_s16 }
  0x22   : > { %p899_p9 = pnand %p897_p10, %p885_p1  ;;  %p905_p12 = scmp.lt.s32.totalorder %s903_s20, %s896_s13 }
  0x24   : > { %p900_p0 = pneg %p899_p9  ;;  %p906_p11 = por %p905_p12, %p904_p2 }
  0x26   : > { %p907_p6 = pnand %p906_p11, %p900_p0 }
  0x28   : > { %910 = shalt.err (!%p907_p6)
}
  0x29   : > { %s978_s21 = smov 128   ;;  %s979_s22 = smov 8  }
  0x2a   : > { %833 = dma.hbm_to_vmem [thread:$0]  (!%p1067_p13), %s1063_s25, 1024, %s1071_s27, %s1073_s29, %s978_s21, %s978_s21, %s979_s22  }
  0x2b   : > { %p813_p9 = scmp.ge.s32.totalorder %s975_s9, 1  ;;  %p107_p1 = scmp.lt.s32.totalorder %s975_s9, 3 }
  0x2d   : > { %p108_p3 = pnand %p813_p9, %p107_p1 }
  0x2e   : > { %s1097_s23 = sand.u32 (!%p108_p3), 1, %s967_s7   ;;  %p1428_p6 = scmp.ne.s32.totalorder (!%p108_p3), %s1424_s17, 0 }
  0x2f   : > { %111 = sbr.rel (%p108_p3) target bundleno = 476 (0x1dc), region = 24  ;;  %s814_s24 = sshll.u32 (!%p108_p3), %s1097_s23, 6 }
  0x30   : > { %s114_s26 = scalar_lea.sflag (!%p108_p3), [#allocation5], %s1097_s23  ;;  %s117_s30 = scalar_lea.vmem (!%p108_p3), [#allocation4], %s814_s24 }
  0x34   : > { %954 = dma.done.wait (%p1428_p6), %s114_s26, 1024  }
  0x35   : > { %956 = vsyncadd (%p1428_p6), %s114_s26, 4294966272  ;;  %v1107_v0 = vld [vmem:[%s117_s30 + $0x10] sm:$0xff]  ;;  %v1109_v1 = vld [vmem:[%s117_s30] sm:$0xff]  ;;  %s980_s25 = smov 2   ;;  %s981_s17 = smov 126   ;;  %vm178_vm0 = vcmask 146448  }
  0x36   : > { %158 = vrot.lane.b32.xlu1 %v1107_v0, %s980_s25  ;;  %154 = vrot.lane.b32.xlu0 %v1109_v1, %s980_s25  ;;  %v1113_v2 = vld [vmem:[%s117_s30 + $0x18] sm:$0xff]  ;;  %v1115_v3 = vld [vmem:[%s117_s30 + $0x8] sm:$0xff]  ;;  %s982_s27 = smov 4   ;;  %s983_s28 = smov 6   ;;  %vm211_vm1 = vcmask 7168   ;;  %vm244_vm2 = vcmask 154768  }
  0x37   : > { %v1119_v4 = vld [vmem:[%s117_s30 + $0x28] sm:$0xff]  ;;  %v1121_v5 = vld [vmem:[%s117_s30 + $0x20] sm:$0xff]  ;;  %v1125_v6 = vld [vmem:[%s117_s30 + $0x38] sm:$0xff]  ;;  %vm253_vm3 = vcmask 15368   ;;  %vm286_vm4 = vcmask 162968   ;;  %vm299_vm5 = vcmask 155648  }
  0x38   : > { %v1127_v7 = vld [vmem:[%s117_s30 + $0x30] sm:$0xff]  ;;  %s984_s29 = smov 127   ;;  %s985_s2 = smov 125   ;;  %vm592_vm6 = vcmask 130048   ;;  %vm595_vm7 = vcmask 125952  }
  0x39   : > { %s986_s3 = smov 124   ;;  %s1349_s4 = scalar_lea.vmem [#allocation7], %s814_s24 }
  0x3a   : > { %160 = vrot.lane.b32.xlu1 %v1113_v2, %s980_s25  ;;  %156 = vrot.lane.b32.xlu0 %v1115_v3, %s980_s25  ;;  %s825_s5 = sshll.u32 %s1021_s10, 10  ;;  %s733_s11 = sshll.u32 %s1349_s4, 4  ;;  %s1372_s11 = int_to_ptr.vmem [resolvable:$true] %s733_s11 }
  0x3b   : > { %s1370_s16 = scalar_lea.hbm %s1420_s1, %s825_s5  ;;  %s719_s10 = scalar_lea.sflag [#allocation6], %s1097_s23 }
  0x3c   : > { %s911_s20 = scalar_lea.vmem %s1372_s11, 1024  ;;  %p1429_p12 = scmp.ne.s32.totalorder %s1425_s18, 0 }
  0x3d   : > { %p912_p11 = scmp.ne.s32.totalorder %s1372_s11, %s911_s20  ;;  %s987_s21 = smov [#allocation7]  }
  0x3e   : > { %164 = vrot.lane.b32.xlu1 %v1119_v4, %s980_s25  ;;  %162 = vrot.lane.b32.xlu0 %v1121_v5, %s980_s25  ;;  %s915_s22 = sshll.u32 %s987_s21, 4  ;;  %s916_s22 = int_to_ptr.vmem [resolvable:$false] %s915_s22 }
  0x3f   : > { %p913_p13 = pnand %p912_p11, %p1429_p12  ;;  %s917_s24 = scalar_lea.vmem %s916_s22, 2048 }
  0x40   : > { %p918_p5 = scmp.lt.s32.totalorder %s1372_s11, %s916_s22  ;;  %p919_p7 = scmp.lt.s32.totalorder %s917_s24, %s911_s20 }
  0x41   : > { %p914_p4 = pneg %p913_p13 }
  0x42   : > { %168 = vrot.lane.b32.xlu1 %v1125_v6, %s980_s25  ;;  %166 = vrot.lane.b32.xlu0 %v1127_v7, %s980_s25  ;;  %p920_p8 = por %p919_p7, %p918_p5 }
  0x44   : > { %p921_p10 = pnand %p920_p8, %p914_p4 }
  0x46   : > { %189 = vrot.lane.b32.xlu1 %v1115_v3, %s981_s17  ;;  %187 = vrot.lane.b32.xlu0 %v1109_v1, %s981_s17 }
  0x4a   : > { %193 = vrot.lane.b32.xlu1 %v1113_v2, %s981_s17  ;;  %191 = vrot.lane.b32.xlu0 %v1107_v0, %s981_s17 }
  0x4e   : > { %197 = vrot.lane.b32.xlu1 %v1119_v4, %s981_s17  ;;  %195 = vrot.lane.b32.xlu0 %v1121_v5, %s981_s17 }
  0x52   : > { %201 = vrot.lane.b32.xlu1 %v1125_v6, %s981_s17  ;;  %199 = vrot.lane.b32.xlu0 %v1127_v7, %s981_s17 }
  0x56   : > { %222 = vrot.lane.b32.xlu1 %v1115_v3, %s982_s27  ;;  %220 = vrot.lane.b32.xlu0 %v1109_v1, %s982_s27 }
  0x5a   : > { %226 = vrot.lane.b32.xlu1 %v1113_v2, %s982_s27  ;;  %224 = vrot.lane.b32.xlu0 %v1107_v0, %s982_s27 }
  0x5e   : > { %230 = vrot.lane.b32.xlu1 %v1119_v4, %s982_s27  ;;  %228 = vrot.lane.b32.xlu0 %v1121_v5, %s982_s27 }
  0x62   : > { %234 = vrot.lane.b32.xlu1 %v1125_v6, %s982_s27  ;;  %232 = vrot.lane.b32.xlu0 %v1127_v7, %s982_s27 }
  0x66   : > { %264 = vrot.lane.b32.xlu1 %v1115_v3, %s983_s28  ;;  %262 = vrot.lane.b32.xlu0 %v1109_v1, %s983_s28 }
  0x6a   : > { %268 = vrot.lane.b32.xlu1 %v1113_v2, %s983_s28  ;;  %266 = vrot.lane.b32.xlu0 %v1107_v0, %s983_s28 }
  0x6e   : > { %272 = vrot.lane.b32.xlu1 %v1119_v4, %s983_s28  ;;  %270 = vrot.lane.b32.xlu0 %v1121_v5, %s983_s28 }
  0x72   : > { %276 = vrot.lane.b32.xlu1 %v1125_v6, %s983_s28  ;;  %274 = vrot.lane.b32.xlu0 %v1127_v7, %s983_s28 }
  0xa8   : > { %v159_v8 = vpop.permute.xlu1 %158  ;;  %v155_v9 = vpop.permute.xlu0 %154 }
  0xa9   : > { %181 = vst.msk [vmem:[#allocation2 + $0x1a] sm:$0xff] %vm178_vm0, %v159_v8  ;;  %179 = vst.msk [vmem:[#allocation2 + $0x2] sm:$0xff] %vm178_vm0, %v155_v9 }
  0xac   : > { %v161_v10 = vpop.permute.xlu1 %160  ;;  %v157_v11 = vpop.permute.xlu0 %156 }
  0xad   : > { %182 = vst.msk [vmem:[#allocation2 + $0x22] sm:$0xff] %vm178_vm0, %v161_v10  ;;  %180 = vst.msk [vmem:[#allocation2 + $0xa] sm:$0xff] %vm178_vm0, %v157_v11 }
  0xb0   : > { %v165_v12 = vpop.permute.xlu1 %164  ;;  %v163_v13 = vpop.permute.xlu0 %162 }
  0xb1   : > { %184 = vst.msk [vmem:[#allocation2 + $0x3a] sm:$0xff] %vm178_vm0, %v165_v12  ;;  %183 = vst.msk [vmem:[#allocation2 + $0x32] sm:$0xff] %vm178_vm0, %v163_v13 }
  0xb4   : > { %v169_v14 = vpop.permute.xlu1 %168  ;;  %v167_v15 = vpop.permute.xlu0 %166 }
  0xb5   : > { %186 = vst.msk [vmem:[#allocation2 + $0x52] sm:$0xff] %vm178_vm0, %v169_v14  ;;  %185 = vst.msk [vmem:[#allocation2 + $0x4a] sm:$0xff] %vm178_vm0, %v167_v15 }
  0xb8   : > { %v190_v16 = vpop.permute.xlu1 %189  ;;  %v188_v17 = vpop.permute.xlu0 %187 }
  0xb9   : > { %213 = vst.msk [vmem:[#allocation2 + $0xa] sm:$0xff] %vm211_vm1, %v190_v16  ;;  %212 = vst.msk [vmem:[#allocation2 + $0x2] sm:$0xff] %vm211_vm1, %v188_v17 }
  0xbc   : > { %v194_v18 = vpop.permute.xlu1 %193  ;;  %v192_v19 = vpop.permute.xlu0 %191 }
  0xbd   : > { %215 = vst.msk [vmem:[#allocation2 + $0x22] sm:$0xff] %vm211_vm1, %v194_v18  ;;  %214 = vst.msk [vmem:[#allocation2 + $0x1a] sm:$0xff] %vm211_vm1, %v192_v19 }
  0xc0   : > { %v198_v20 = vpop.permute.xlu1 %197  ;;  %v196_v21 = vpop.permute.xlu0 %195 }
  0xc1   : > { %217 = vst.msk [vmem:[#allocation2 + $0x3a] sm:$0xff] %vm211_vm1, %v198_v20  ;;  %216 = vst.msk [vmem:[#allocation2 + $0x32] sm:$0xff] %vm211_vm1, %v196_v21 }
  0xc4   : > { %v202_v22 = vpop.permute.xlu1 %201  ;;  %v200_v23 = vpop.permute.xlu0 %199 }
  0xc5   : > { %219 = vst.msk [vmem:[#allocation2 + $0x52] sm:$0xff] %vm211_vm1, %v202_v22  ;;  %218 = vst.msk [vmem:[#allocation2 + $0x4a] sm:$0xff] %vm211_vm1, %v200_v23 }
  0xc8   : > { %v223_v24 = vpop.permute.xlu1 %222  ;;  %v221_v25 = vpop.permute.xlu0 %220 }
  0xc9   : > { %246 = vst.msk [vmem:[#allocation2 + $0xa] sm:$0xff] %vm244_vm2, %v223_v24  ;;  %245 = vst.msk [vmem:[#allocation2 + $0x2] sm:$0xff] %vm244_vm2, %v221_v25 }
  0xca   : > { %255 = vst.msk [vmem:[#allocation2 + $0xa] sm:$0xff] %vm253_vm3, %v1115_v3  ;;  %254 = vst.msk [vmem:[#allocation2 + $0x2] sm:$0xff] %vm253_vm3, %v1109_v1 }
  0xcc   : > { %v227_v26 = vpop.permute.xlu1 %226  ;;  %v225_v27 = vpop.permute.xlu0 %224 }
  0xcd   : > { %248 = vst.msk [vmem:[#allocation2 + $0x22] sm:$0xff] %vm244_vm2, %v227_v26  ;;  %247 = vst.msk [vmem:[#allocation2 + $0x1a] sm:$0xff] %vm244_vm2, %v225_v27 }
  0xce   : > { %256 = vst.msk [vmem:[#allocation2 + $0x1a] sm:$0xff] %vm253_vm3, %v1107_v0  ;;  %257 = vst.msk [vmem:[#allocation2 + $0x22] sm:$0xff] %vm253_vm3, %v1113_v2 }
  0xd0   : > { %v231_v28 = vpop.permute.xlu1 %230  ;;  %v229_v29 = vpop.permute.xlu0 %228 }
  0xd1   : > { %250 = vst.msk [vmem:[#allocation2 + $0x3a] sm:$0xff] %vm244_vm2, %v231_v28  ;;  %249 = vst.msk [vmem:[#allocation2 + $0x32] sm:$0xff] %vm244_vm2, %v229_v29 }
  0xd2   : > { %258 = vst.msk [vmem:[#allocation2 + $0x32] sm:$0xff] %vm253_vm3, %v1121_v5  ;;  %259 = vst.msk [vmem:[#allocation2 + $0x3a] sm:$0xff] %vm253_vm3, %v1119_v4 }
  0xd4   : > { %v235_v30 = vpop.permute.xlu1 %234  ;;  %v233_v31 = vpop.permute.xlu0 %232 }
  0xd5   : > { %252 = vst.msk [vmem:[#allocation2 + $0x52] sm:$0xff] %vm244_vm2, %v235_v30  ;;  %251 = vst.msk [vmem:[#allocation2 + $0x4a] sm:$0xff] %vm244_vm2, %v233_v31 }
  0xd6   : > { %260 = vst.msk [vmem:[#allocation2 + $0x4a] sm:$0xff] %vm253_vm3, %v1127_v7  ;;  %261 = vst.msk [vmem:[#allocation2 + $0x52] sm:$0xff] %vm253_vm3, %v1125_v6 }
  0xd8   : > { %v265_v32 = vpop.permute.xlu1 %264  ;;  %v263_v33 = vpop.permute.xlu0 %262 }
  0xd9   : > { %288 = vst.msk [vmem:[#allocation2 + $0xa] sm:$0xff] %vm286_vm4, %v265_v32  ;;  %287 = vst.msk [vmem:[#allocation2 + $0x2] sm:$0xff] %vm286_vm4, %v263_v33 }
  0xdc   : > { %v269_v34 = vpop.permute.xlu1 %268  ;;  %v267_v35 = vpop.permute.xlu0 %266 }
  0xdd   : > { %290 = vst.msk [vmem:[#allocation2 + $0x22] sm:$0xff] %vm286_vm4, %v269_v34  ;;  %289 = vst.msk [vmem:[#allocation2 + $0x1a] sm:$0xff] %vm286_vm4, %v267_v35 }
  0xe0   : > { %v304_v36 = vld [vmem:[#allocation2 + $0x10] sm:$0x1]  ;;  %v320_v37 = vld [vmem:[#allocation2 + $0xf] sm:$0x1]  ;;  %v295_v38 = vld [vmem:[#allocation2 + $0x4] sm:$0x1]  ;;  %v273_v39 = vpop.permute.xlu1 %272  ;;  %v271_v40 = vpop.permute.xlu0 %270 }
  0xe1   : > { %v312_v41 = vld [vmem:[#allocation2 + $0x3] sm:$0x1]  ;;  %292 = vst.msk [vmem:[#allocation2 + $0x3a] sm:$0xff] %vm286_vm4, %v273_v39  ;;  %291 = vst.msk [vmem:[#allocation2 + $0x32] sm:$0xff] %vm286_vm4, %v271_v40  ;;  %v329_v42 = vld [vmem:[#allocation2 + $0x8] sm:$0xff] }
  0xe2   : > { %300 = vst.msk [vmem:[#allocation2] sm:$0x1] %vm299_vm5, %v295_v38  ;;  %308 = vst.msk [vmem:[#allocation2 + $0x12] sm:$0x1] %vm299_vm5, %v304_v36  ;;  %438 = vrot.lane.b32.xlu1 %v329_v42, %s981_s17  ;;  %v353_v55 = vmul.f32 1.7766286e-17, %v329_v42 }
  0xe3   : > { %324 = vst.msk [vmem:[#allocation2 + $0x13] sm:$0x1] %vm299_vm5, %v320_v37  ;;  %316 = vst.msk [vmem:[#allocation2 + $0x1] sm:$0x1] %vm299_vm5, %v312_v41  ;;  %v1246_v0 = vmul.f32 0.0, %v329_v42 }
  0xe4   : > { %v305_v43 = vld [vmem:[#allocation2 + $0x28] sm:$0x1]  ;;  %v321_v44 = vld [vmem:[#allocation2 + $0x27] sm:$0x1]  ;;  %v296_v45 = vld [vmem:[#allocation2 + $0x1c] sm:$0x1]  ;;  %v277_v46 = vpop.permute.xlu1 %276  ;;  %v275_v47 = vpop.permute.xlu0 %274 }
  0xe5   : > { %v313_v48 = vld [vmem:[#allocation2 + $0x1b] sm:$0x1]  ;;  %294 = vst.msk [vmem:[#allocation2 + $0x52] sm:$0xff] %vm286_vm4, %v277_v46  ;;  %293 = vst.msk [vmem:[#allocation2 + $0x4a] sm:$0xff] %vm286_vm4, %v275_v47  ;;  %v332_v49 = vld [vmem:[#allocation2 + $0x20] sm:$0xff] }
  0xe6   : > { %301 = vst.msk [vmem:[#allocation2 + $0x18] sm:$0x1] %vm299_vm5, %v296_v45  ;;  %309 = vst.msk [vmem:[#allocation2 + $0x2a] sm:$0x1] %vm299_vm5, %v305_v43  ;;  %444 = vrot.lane.b32.xlu0 %v332_v49, %s981_s17  ;;  %v356_v62 = vmul.f32 1.7766286e-17, %v332_v49 }
  0xe7   : > { %325 = vst.msk [vmem:[#allocation2 + $0x2b] sm:$0x1] %vm299_vm5, %v321_v44  ;;  %317 = vst.msk [vmem:[#allocation2 + $0x19] sm:$0x1] %vm299_vm5, %v313_v48  ;;  %v1251_v1 = vmul.f32 0.0, %v332_v49 }
  0xe8   : > { %v306_v50 = vld [vmem:[#allocation2 + $0x40] sm:$0x1]  ;;  %v322_v51 = vld [vmem:[#allocation2 + $0x3f] sm:$0x1]  ;;  %v297_v52 = vld [vmem:[#allocation2 + $0x34] sm:$0x1] }
  0xe9   : > { %v314_v53 = vld [vmem:[#allocation2 + $0x33] sm:$0x1]  ;;  %v1221_v54 = vld [vmem:[#allocation2 + $0x38] sm:$0xff]  ;;  %302 = vst.msk [vmem:[#allocation2 + $0x30] sm:$0x1] %vm299_vm5, %v297_v52 }
  0xea   : > { %310 = vst.msk [vmem:[#allocation2 + $0x42] sm:$0x1] %vm299_vm5, %v306_v50  ;;  %326 = vst.msk [vmem:[#allocation2 + $0x43] sm:$0x1] %vm299_vm5, %v322_v51  ;;  %450 = vrot.lane.b32.xlu1 %v1221_v54, %s981_s17  ;;  %v359_v61 = vmul.f32 1.7766286e-17, %v1221_v54 }
  0xeb   : > { %318 = vst.msk [vmem:[#allocation2 + $0x31] sm:$0x1] %vm299_vm5, %v314_v53  ;;  %v328_v4 = vld [vmem:[#allocation2] sm:$0xff]  ;;  %v330_v5 = vld [vmem:[#allocation2 + $0x10] sm:$0xf]  ;;  %v347_v22 = vmul.f32 0.0, %v1221_v54 }
  0xec   : > { %v307_v56 = vld [vmem:[#allocation2 + $0x58] sm:$0x1]  ;;  %v323_v57 = vld [vmem:[#allocation2 + $0x57] sm:$0x1]  ;;  %v298_v58 = vld [vmem:[#allocation2 + $0x4c] sm:$0x1] }
  0xed   : > { %v315_v59 = vld [vmem:[#allocation2 + $0x4b] sm:$0x1]  ;;  %v1229_v60 = vld [vmem:[#allocation2 + $0x50] sm:$0xff]  ;;  %303 = vst.msk [vmem:[#allocation2 + $0x48] sm:$0x1] %vm299_vm5, %v298_v58  ;;  %v1283_v19 = vmul.f32 0.0, %v328_v4 }
  0xee   : > { %311 = vst.msk [vmem:[#allocation2 + $0x5a] sm:$0x1] %vm299_vm5, %v307_v56  ;;  %327 = vst.msk [vmem:[#allocation2 + $0x5b] sm:$0x1] %vm299_vm5, %v323_v57  ;;  %378 = vrot.lane.b32.xlu1 %v353_v55, %s984_s29  ;;  %456 = vrot.lane.b32.xlu0 %v1229_v60, %s981_s17  ;;  %v362_v63 = vmul.f32 1.7766286e-17, %v1229_v60 }
  0xef   : > { %319 = vst.msk [vmem:[#allocation2 + $0x49] sm:$0x1] %vm299_vm5, %v315_v59  ;;  %v331_v2 = vld [vmem:[#allocation2 + $0x18] sm:$0xff]  ;;  %v333_v3 = vld [vmem:[#allocation2 + $0x28] sm:$0xf]  ;;  %v1291_v21 = vmul.f32 0.0, %v330_v5 }
  0xf0   : > { %v355_v9 = vmul.f32 1.7766286e-17, %v331_v2  ;;  %v352_v11 = vmul.f32 1.7766286e-17, %v328_v4  ;;  %v357_v12 = vmul.f32 1.7766286e-17, %v333_v3 }
  0xf1   : > { %v336_v10 = vld [vmem:[#allocation2 + $0x40] sm:$0xf]  ;;  %v354_v13 = vmul.f32 1.7766286e-17, %v330_v5  ;;  %v1278_v18 = vmul.f32 0.0, %v331_v2  ;;  %v1285_v20 = vmul.f32 0.0, %v333_v3 }
  0xf2   : > { %390 = vrot.lane.b32.xlu1 %v359_v61, %s984_s29  ;;  %384 = vrot.lane.b32.xlu0 %v356_v62, %s984_s29  ;;  %v334_v7 = vld [vmem:[#allocation2 + $0x30] sm:$0xff]  ;;  %v360_v17 = vmul.f32 1.7766286e-17, %v336_v10  ;;  %v1305_v25 = vmul.f32 0.0, %v336_v10  ;;  %v350_v27 = vmul.f32 0.0, %v1229_v60 }
  0xf3   : > { %v358_v15 = vmul.f32 1.7766286e-17, %v334_v7  ;;  %v1297_v23 = vmul.f32 0.0, %v334_v7 }
  0xf5   : > { %v339_v8 = vld [vmem:[#allocation2 + $0x58] sm:$0xf] }
  0xf6   : > { %486 = vrot.lane.b32.xlu1 %v353_v55, %s985_s2  ;;  %396 = vrot.lane.b32.xlu0 %v362_v63, %s984_s29  ;;  %v337_v6 = vld [vmem:[#allocation2 + $0x48] sm:$0xff]  ;;  %v363_v16 = vmul.f32 1.7766286e-17, %v339_v8  ;;  %v1307_v26 = vmul.f32 0.0, %v339_v8 }
  0xf7   : > { %v361_v14 = vmul.f32 1.7766286e-17, %v337_v6  ;;  %v1299_v24 = vmul.f32 0.0, %v337_v6 }
  0xfa   : > { %498 = vrot.lane.b32.xlu1 %v359_v61, %s985_s2  ;;  %492 = vrot.lane.b32.xlu0 %v356_v62, %s985_s2 }
  0xfe   : > { %546 = vrot.lane.b32.xlu1 %v1246_v0, %s986_s3  ;;  %504 = vrot.lane.b32.xlu0 %v362_v63, %s985_s2 }
 0x102   : > { %442 = vrot.lane.b32.xlu1 %v331_v2, %s981_s17  ;;  %552 = vrot.lane.b32.xlu0 %v1251_v1, %s986_s3 }
 0x106   : > { %446 = vrot.lane.b32.xlu1 %v333_v3, %s981_s17  ;;  %436 = vrot.lane.b32.xlu0 %v328_v4, %s981_s17 }
 0x10a   : > { %440 = vrot.lane.b32.xlu0 %v330_v5, %s981_s17  ;;  %454 = vrot.lane.b32.xlu1 %v337_v6, %s981_s17 }
 0x10e   : > { %448 = vrot.lane.b32.xlu0 %v334_v7, %s981_s17  ;;  %458 = vrot.lane.b32.xlu1 %v339_v8, %s981_s17 }
 0x112   : > { %452 = vrot.lane.b32.xlu0 %v336_v10, %s981_s17  ;;  %382 = vrot.lane.b32.xlu1 %v355_v9, %s984_s29 }
 0x116   : > { %376 = vrot.lane.b32.xlu0 %v352_v11, %s984_s29  ;;  %386 = vrot.lane.b32.xlu1 %v357_v12, %s984_s29 }
 0x11a   : > { %380 = vrot.lane.b32.xlu0 %v354_v13, %s984_s29  ;;  %394 = vrot.lane.b32.xlu1 %v361_v14, %s984_s29 }
 0x11e   : > { %388 = vrot.lane.b32.xlu0 %v358_v15, %s984_s29  ;;  %398 = vrot.lane.b32.xlu1 %v363_v16, %s984_s29 }
 0x122   : > { %392 = vrot.lane.b32.xlu0 %v360_v17, %s984_s29  ;;  %490 = vrot.lane.b32.xlu1 %v355_v9, %s985_s2 }
 0x126   : > { %484 = vrot.lane.b32.xlu0 %v352_v11, %s985_s2  ;;  %494 = vrot.lane.b32.xlu1 %v357_v12, %s985_s2 }
 0x12a   : > { %488 = vrot.lane.b32.xlu0 %v354_v13, %s985_s2  ;;  %502 = vrot.lane.b32.xlu1 %v361_v14, %s985_s2 }
 0x12e   : > { %496 = vrot.lane.b32.xlu0 %v358_v15, %s985_s2  ;;  %506 = vrot.lane.b32.xlu1 %v363_v16, %s985_s2 }
 0x132   : > { %500 = vrot.lane.b32.xlu0 %v360_v17, %s985_s2  ;;  %550 = vrot.lane.b32.xlu1 %v1278_v18, %s986_s3 }
 0x136   : > { %544 = vrot.lane.b32.xlu0 %v1283_v19, %s986_s3  ;;  %554 = vrot.lane.b32.xlu1 %v1285_v20, %s986_s3 }
 0x13a   : > { %548 = vrot.lane.b32.xlu0 %v1291_v21, %s986_s3  ;;  %558 = vrot.lane.b32.xlu1 %v347_v22, %s986_s3 }
 0x13e   : > { %556 = vrot.lane.b32.xlu0 %v1297_v23, %s986_s3  ;;  %562 = vrot.lane.b32.xlu1 %v1299_v24, %s986_s3 }
 0x142   : > { %560 = vrot.lane.b32.xlu0 %v1305_v25, %s986_s3  ;;  %566 = vrot.lane.b32.xlu1 %v1307_v26, %s986_s3 }
 0x146   : > { %564 = vrot.lane.b32.xlu0 %v350_v27, %s986_s3 }
 0x154   : > { %v439_v28 = vpop.permute.xlu1 %438 }
 0x158   : > { %v445_v29 = vpop.permute.xlu0 %444 }
 0x15c   : > { %v451_v30 = vpop.permute.xlu1 %450 }
 0x160   : > { %v379_v31 = vpop.permute.xlu1 %378  ;;  %v457_v32 = vpop.permute.xlu0 %456 }
 0x161   : > { %v413_v39 = vadd.f32 %v379_v31, %v1246_v0 }
 0x163   : > { %v473_v45 = vadd.f32 %v439_v28, %v413_v39 }
 0x164   : > { %v391_v33 = vpop.permute.xlu1 %390  ;;  %v385_v34 = vpop.permute.xlu0 %384 }
 0x165   : > { %v419_v35 = vadd.f32 %v391_v33, %v347_v22  ;;  %v416_v44 = vadd.f32 %v385_v34, %v1251_v1 }
 0x167   : > { %v1315_v36 = vadd.f32 %v451_v30, %v419_v35  ;;  %v476_v49 = vadd.f32 %v445_v29, %v416_v44 }
 0x168   : > { %v487_v37 = vpop.permute.xlu1 %486  ;;  %v397_v38 = vpop.permute.xlu0 %396 }
 0x169   : > { %v422_v40 = vadd.f32 %v397_v38, %v350_v27  ;;  %v521_v46 = vadd.f32 %v487_v37, %v473_v45 }
 0x16b   : > { %v482_v41 = vadd.f32 %v457_v32, %v422_v40 }
 0x16c   : > { %v499_v42 = vpop.permute.xlu1 %498  ;;  %v493_v43 = vpop.permute.xlu0 %492 }
 0x16d   : > { %v524_v52 = vadd.f32 %v493_v43, %v476_v49  ;;  %v527_v40 = vadd.f32 %v499_v42, %v1315_v36 }
 0x170   : > { %v547_v47 = vpop.permute.xlu1 %546  ;;  %v505_v48 = vpop.permute.xlu0 %504 }
 0x171   : > { %v581_v50 = vadd.f32 %v547_v47, %v521_v46  ;;  %v1319_v51 = vadd.f32 %v505_v48, %v482_v41 }
 0x173   : > { %594 = vst.msk [vmem:[#allocation3 + $0x8] sm:$0xff] %vm592_vm6, %v581_v50 }
 0x174   : > { %v443_v53 = vpop.permute.xlu1 %442  ;;  %v553_v54 = vpop.permute.xlu0 %552 }
 0x175   : > { %v584_v55 = vadd.f32 %v553_v54, %v524_v52 }
 0x177   : > { %598 = vst.msk [vmem:[#allocation3 + $0x20] sm:$0xff] %vm592_vm6, %v584_v55 }
 0x178   : > { %v447_v56 = vpop.permute.xlu1 %446  ;;  %v437_v57 = vpop.permute.xlu0 %436 }
 0x17c   : > { %v455_v58 = vpop.permute.xlu1 %454  ;;  %v441_v59 = vpop.permute.xlu0 %440 }
 0x180   : > { %v1323_v60 = vpop.permute.xlu1 %458  ;;  %v449_v61 = vpop.permute.xlu0 %448 }
 0x184   : > { %v383_v62 = vpop.permute.xlu1 %382  ;;  %v1325_v63 = vpop.permute.xlu0 %452 }
 0x185   : > { %v415_v12 = vadd.f32 %v383_v62, %v1278_v18 }
 0x187   : > { %v475_v17 = vadd.f32 %v443_v53, %v415_v12  ;;  %v609_v53 = vld [vmem:[#allocation3 + $0x20] sm:$0xff]  ;;  %v607_v12 = vld [vmem:[#allocation3 + $0x8] sm:$0xff] }
 0x188   : > { %v387_v0 = vpop.permute.xlu1 %386  ;;  %v377_v1 = vpop.permute.xlu0 %376 }
 0x189   : > { %v417_v15 = vadd.f32 %v387_v0, %v1285_v20  ;;  %v412_v16 = vadd.f32 %v377_v1, %v1283_v19  ;;  %v617_v1 = vmul.f32 0.0, %v609_v53 }
 0x18b   : > { %v477_v30 = vadd.f32 %v447_v56, %v417_v15  ;;  %v472_v31 = vadd.f32 %v437_v57, %v412_v16 }
 0x18c   : > { %v395_v2 = vpop.permute.xlu1 %394  ;;  %v381_v3 = vpop.permute.xlu0 %380 }
 0x18d   : > { %v414_v29 = vadd.f32 %v381_v3, %v1291_v21  ;;  %v421_v18 = vadd.f32 %v395_v2, %v1299_v24 }
 0x18f   : > { %v474_v37 = vadd.f32 %v441_v59, %v414_v29  ;;  %v481_v44 = vadd.f32 %v455_v58, %v421_v18 }
 0x190   : > { %v399_v4 = vpop.permute.xlu1 %398  ;;  %v389_v5 = vpop.permute.xlu0 %388 }
 0x191   : > { %v418_v19 = vadd.f32 %v389_v5, %v1297_v23  ;;  %v423_v47 = vadd.f32 %v399_v4, %v1307_v26 }
 0x193   : > { %v478_v45 = vadd.f32 %v449_v61, %v418_v19  ;;  %v483_v26 = vadd.f32 %v1323_v60, %v423_v47 }
 0x194   : > { %v491_v6 = vpop.permute.xlu1 %490  ;;  %v393_v7 = vpop.permute.xlu0 %392 }
 0x195   : > { %v523_v22 = vadd.f32 %v491_v6, %v475_v17  ;;  %v420_v23 = vadd.f32 %v393_v7, %v1305_v25 }
 0x197   : > { %v480_v62 = vadd.f32 %v1325_v63, %v420_v23 }
 0x198   : > { %v495_v8 = vpop.permute.xlu1 %494  ;;  %v485_v9 = vpop.permute.xlu0 %484 }
 0x199   : > { %v525_v33 = vadd.f32 %v495_v8, %v477_v30  ;;  %v520_v34 = vadd.f32 %v485_v9, %v472_v31 }
 0x19c   : > { %v503_v10 = vpop.permute.xlu1 %502  ;;  %v489_v11 = vpop.permute.xlu0 %488 }
 0x19d   : > { %v522_v21 = vadd.f32 %v489_v11, %v474_v37  ;;  %v529_v50 = vadd.f32 %v503_v10, %v481_v44 }
 0x1a0   : > { %v507_v13 = vpop.permute.xlu1 %506  ;;  %v497_v14 = vpop.permute.xlu0 %496 }
 0x1a1   : > { %v526_v52 = vadd.f32 %v497_v14, %v478_v45  ;;  %v531_v6 = vadd.f32 %v507_v13, %v483_v26 }
 0x1a4   : > { %v551_v27 = vpop.permute.xlu1 %550  ;;  %v501_v28 = vpop.permute.xlu0 %500 }
 0x1a5   : > { %v583_v32 = vadd.f32 %v551_v27, %v523_v22  ;;  %v528_v7 = vadd.f32 %v501_v28, %v480_v62 }
 0x1a7   : > { %597 = vst.msk [vmem:[#allocation3 + $0x18] sm:$0xff] %vm592_vm6, %v583_v32 }
 0x1a8   : > { %v555_v35 = vpop.permute.xlu1 %554  ;;  %v545_v20 = vpop.permute.xlu0 %544 }
 0x1a9   : > { %v585_v38 = vadd.f32 %v555_v35, %v525_v33  ;;  %v580_v39 = vadd.f32 %v545_v20, %v520_v34  ;;  %v615_v34 = vmul.f32 0.0, %v607_v12 }
 0x1ab   : > { %599 = vst.msk [vmem:[#allocation3 + $0x28] sm:$0xf] %vm595_vm7, %v585_v38 }
 0x1ac   : > { %593 = vst.msk [vmem:[#allocation3] sm:$0xff] %vm592_vm6, %v580_v39  ;;  %v559_v41 = vpop.permute.xlu1 %558  ;;  %v549_v43 = vpop.permute.xlu0 %548 }
 0x1ad   : > { %v587_v24 = vadd.f32 %v559_v41, %v527_v40  ;;  %v582_v46 = vadd.f32 %v549_v43, %v522_v21 }
 0x1ae   : > { %v608_v48 = vld [vmem:[#allocation3 + $0x18] sm:$0xff] }
 0x1af   : > { %v624_v49 = vld [vmem:[#allocation3 + $0x19] sm:$0xff]  ;;  %v616_v36 = vmul.f32 0.0, %v608_v48  ;;  %601 = vst.msk [vmem:[#allocation3 + $0x38] sm:$0xff] %vm592_vm6, %v587_v24 }
 0x1b0   : > { %v632_v42 = vmul.f32 1.7766286e-17, %v624_v49  ;;  %596 = vst.msk [vmem:[#allocation3 + $0x10] sm:$0xf] %vm595_vm7, %v582_v46  ;;  %v664_v54 = vld [vmem:[#allocation3 + $0x1b] sm:$0xff]  ;;  %v563_v55 = vpop.permute.xlu1 %562  ;;  %v557_v56 = vpop.permute.xlu0 %556 }
 0x1b1   : > { %v589_v58 = vadd.f32 %v563_v55, %v529_v50  ;;  %v586_v59 = vadd.f32 %v557_v56, %v526_v52  ;;  %v648_v25 = vld [vmem:[#allocation3 + $0x1a] sm:$0xff]  ;;  %v672_v3 = vmul.f32 1.7766286e-17, %v664_v54 }
 0x1b2   : > { %v640_v57 = vadd.f32 %v632_v42, %v616_v36  ;;  %v688_v61 = vld [vmem:[#allocation3 + $0x1c] sm:$0xff]  ;;  %v689_v16 = vld [vmem:[#allocation3 + $0x24] sm:$0xff] }
 0x1b3   : > { %v625_v0 = vld [vmem:[#allocation3 + $0x21] sm:$0xff]  ;;  %603 = vst.msk [vmem:[#allocation3 + $0x48] sm:$0xff] %vm592_vm6, %v589_v58  ;;  %600 = vst.msk [vmem:[#allocation3 + $0x30] sm:$0xff] %vm592_vm6, %v586_v59  ;;  %v696_v63 = vmul.f32 0.0, %v688_v61  ;;  %v697_v18 = vmul.f32 0.0, %v689_v16 }
 0x1b4   : > { %v656_v2 = vadd.f32 %v648_v25, %v640_v57  ;;  %v633_v4 = vmul.f32 1.7766286e-17, %v625_v0  ;;  %v606_v5 = vld [vmem:[#allocation3] sm:$0xff]  ;;  %v567_v60 = vpop.permute.xlu1 %566  ;;  %v561_v11 = vpop.permute.xlu0 %560 }
 0x1b5   : > { %v665_v8 = vld [vmem:[#allocation3 + $0x23] sm:$0xff]  ;;  %v614_v9 = vmul.f32 0.0, %v606_v5  ;;  %v591_v30 = vadd.f32 %v567_v60, %v531_v6  ;;  %v588_v31 = vadd.f32 %v561_v11, %v528_v7 }
 0x1b6   : > { %v622_v10 = vld [vmem:[#allocation3 + $0x1] sm:$0xff]  ;;  %v680_v14 = vadd.f32 %v672_v3, %v656_v2  ;;  %v641_v15 = vadd.f32 %v633_v4, %v617_v1  ;;  %v673_v28 = vmul.f32 1.7766286e-17, %v665_v8  ;;  %v611_v50 = vld [vmem:[#allocation3 + $0x38] sm:$0xff] }
 0x1b7   : > { %v630_v17 = vmul.f32 1.7766286e-17, %v622_v10  ;;  %v649_v22 = vld [vmem:[#allocation3 + $0x22] sm:$0xff]  ;;  %605 = vst.msk [vmem:[#allocation3 + $0x58] sm:$0xf] %vm595_vm7, %v591_v30  ;;  %v663_v21 = vld [vmem:[#allocation3 + $0xb] sm:$0xff] }
 0x1b8   : > { %v662_v27 = vld [vmem:[#allocation3 + $0x3] sm:$0xff]  ;;  %v704_v32 = vadd.f32 %v696_v63, %v680_v14  ;;  %v657_v13 = vadd.f32 %v649_v22, %v641_v15  ;;  %602 = vst.msk [vmem:[#allocation3 + $0x40] sm:$0xf] %vm595_vm7, %v588_v31  ;;  %v565_v37 = vpop.permute.xlu0 %564  ;;  %v687_v48 = vld [vmem:[#allocation3 + $0xc] sm:$0xff]  ;;  %v671_v36 = vmul.f32 1.7766286e-17, %v663_v21 }
 0x1b9   : > { %v623_v29 = vld [vmem:[#allocation3 + $0x9] sm:$0xff]  ;;  %v638_v33 = vadd.f32 %v630_v17, %v614_v9  ;;  %v670_v40 = vmul.f32 1.7766286e-17, %v662_v27  ;;  %v590_v41 = vadd.f32 %v565_v37, %v1319_v51  ;;  %v695_v55 = vmul.f32 0.0, %v687_v48 }
 0x1ba   : > { %v646_v35 = vld [vmem:[#allocation3 + $0x2] sm:$0xff]  ;;  %v631_v19 = vmul.f32 1.7766286e-17, %v623_v29  ;;  %712 = vst.msk [vmem:[%s1349_s4 + $0x10] sm:$0xff] %vm592_vm6, %v704_v32  ;;  %v681_v38 = vadd.f32 %v673_v28, %v657_v13  ;;  %v610_v44 = vld [vmem:[#allocation3 + $0x30] sm:$0xff]  ;;  %v619_v58 = vmul.f32 0.0, %v611_v50 }
 0x1bb   : > { %v686_v20 = vld [vmem:[#allocation3 + $0x4] sm:$0xff]  ;;  %v654_v39 = vadd.f32 %v646_v35, %v638_v33  ;;  %v626_v45 = vld [vmem:[#allocation3 + $0x31] sm:$0xff]  ;;  %v618_v49 = vmul.f32 0.0, %v610_v44  ;;  %604 = vst.msk [vmem:[#allocation3 + $0x50] sm:$0xff] %vm592_vm6, %v590_v41 }
 0x1bc   : > { %v639_v43 = vadd.f32 %v631_v19, %v615_v34  ;;  %v705_v24 = vadd.f32 %v697_v18, %v681_v38  ;;  %v694_v47 = vmul.f32 0.0, %v686_v20  ;;  %v647_v23 = vld [vmem:[#allocation3 + $0xa] sm:$0xff]  ;;  %v634_v42 = vmul.f32 1.7766286e-17, %v626_v45  ;;  %v666_v51 = vld [vmem:[#allocation3 + $0x33] sm:$0xff] }
 0x1bd   : > { %v678_v46 = vadd.f32 %v670_v40, %v654_v39  ;;  %v612_v56 = vld [vmem:[#allocation3 + $0x48] sm:$0xff]  ;;  %v650_v59 = vld [vmem:[#allocation3 + $0x32] sm:$0xff]  ;;  %v674_v0 = vmul.f32 1.7766286e-17, %v666_v51 }
 0x1be   : > { %v655_v52 = vadd.f32 %v647_v23, %v639_v43  ;;  %713 = vst.msk [vmem:[%s1349_s4 + $0x18] sm:$0xff] %vm592_vm6, %v705_v24  ;;  %v642_v57 = vadd.f32 %v634_v42, %v618_v49  ;;  %v690_v26 = vld [vmem:[#allocation3 + $0x34] sm:$0xff]  ;;  %v620_v4 = vmul.f32 0.0, %v612_v56 }
 0x1bf   : > { %v702_v53 = vadd.f32 %v694_v47, %v678_v46  ;;  %v627_v25 = vld [vmem:[#allocation3 + $0x39] sm:$0xff]  ;;  %v698_v6 = vmul.f32 0.0, %v690_v26 }
 0x1c0   : > { %v679_v54 = vadd.f32 %v671_v36, %v655_v52  ;;  %v658_v62 = vadd.f32 %v650_v59, %v642_v57  ;;  %v635_v1 = vmul.f32 1.7766286e-17, %v627_v25  ;;  %v651_v2 = vld [vmem:[#allocation3 + $0x3a] sm:$0xff] }
 0x1c1   : > { %710 = vst.msk [vmem:[%s1349_s4] sm:$0xff] %vm592_vm6, %v702_v53  ;;  %v667_v3 = vld [vmem:[#allocation3 + $0x3b] sm:$0xff] }
 0x1c2   : > { %v703_v61 = vadd.f32 %v695_v55, %v679_v54  ;;  %v682_v5 = vadd.f32 %v674_v0, %v658_v62  ;;  %v643_v7 = vadd.f32 %v635_v1, %v619_v58  ;;  %v613_v8 = vld [vmem:[#allocation3 + $0x50] sm:$0xff]  ;;  %v691_v60 = vld [vmem:[#allocation3 + $0x3c] sm:$0xff]  ;;  %v675_v16 = vmul.f32 1.7766286e-17, %v667_v3 }
 0x1c3   : > { %v628_v9 = vld [vmem:[#allocation3 + $0x49] sm:$0xff]  ;;  %v629_v10 = vld [vmem:[#allocation3 + $0x51] sm:$0xff]  ;;  %v621_v11 = vmul.f32 0.0, %v613_v8  ;;  %v699_v32 = vmul.f32 0.0, %v691_v60 }
 0x1c4   : > { %711 = vst.msk [vmem:[%s1349_s4 + $0x8] sm:$0xff] %vm592_vm6, %v703_v61  ;;  %v636_v12 = vmul.f32 1.7766286e-17, %v628_v9  ;;  %v637_v14 = vmul.f32 1.7766286e-17, %v629_v10  ;;  %v706_v63 = vadd.f32 %v698_v6, %v682_v5  ;;  %v659_v15 = vadd.f32 %v651_v2, %v643_v7  ;;  %v668_v17 = vld [vmem:[#allocation3 + $0x4b] sm:$0xff] }
 0x1c5   : > { %v669_v22 = vld [vmem:[#allocation3 + $0x53] sm:$0xff]  ;;  %v652_v30 = vld [vmem:[#allocation3 + $0x4a] sm:$0xff]  ;;  %v676_v35 = vmul.f32 1.7766286e-17, %v668_v17 }
 0x1c6   : > { %v644_v27 = vadd.f32 %v636_v12, %v620_v4  ;;  %v645_v29 = vadd.f32 %v637_v14, %v621_v11  ;;  %714 = vst.msk [vmem:[%s1349_s4 + $0x20] sm:$0xff] %vm592_vm6, %v706_v63  ;;  %v683_v31 = vadd.f32 %v675_v16, %v659_v15  ;;  %v653_v13 = vld [vmem:[#allocation3 + $0x52] sm:$0xff]  ;;  %v677_v20 = vmul.f32 1.7766286e-17, %v669_v22 }
 0x1c7   : > { %v692_v28 = vld [vmem:[#allocation3 + $0x4c] sm:$0xff]  ;;  %v693_v33 = vld [vmem:[#allocation3 + $0x54] sm:$0xff] }
 0x1c8   : > { %v660_v34 = vadd.f32 %v652_v30, %v644_v27  ;;  %v661_v18 = vadd.f32 %v653_v13, %v645_v29  ;;  %v707_v19 = vadd.f32 %v699_v32, %v683_v31  ;;  %v700_v39 = vmul.f32 0.0, %v692_v28 }
 0x1c9   : > { %v701_v40 = vmul.f32 0.0, %v693_v33 }
 0x1ca   : > { %v684_v37 = vadd.f32 %v676_v35, %v660_v34  ;;  %v685_v38 = vadd.f32 %v677_v20, %v661_v18  ;;  %715 = vst.msk [vmem:[%s1349_s4 + $0x28] sm:$0xff] %vm592_vm6, %v707_v19 }
 0x1cc   : > { %v708_v21 = vadd.f32 %v700_v39, %v684_v37  ;;  %v709_v41 = vadd.f32 %v701_v40, %v685_v38 }
 0x1ce   : > { %716 = vst.msk [vmem:[%s1349_s4 + $0x30] sm:$0xff] %vm592_vm6, %v708_v21  ;;  %717 = vst.msk [vmem:[%s1349_s4 + $0x38] sm:$0xff] %vm592_vm6, %v709_v41 }
 0x1cf   : > { %924 = shalt.err (!%p921_p10)
}
 0x1d0   : > { %s925_s26 = scalar_lea.hbm %s1370_s16, 1024  ;;  %s929_s17 = scalar_lea.hbm %s1420_s1, 2048 }
 0x1d1   : > { %p926_p0 = scmp.ne.s32.totalorder %s1370_s16, %s925_s26  ;;  %p930_p1 = scmp.lt.s32.totalorder %s1370_s16, %s1420_s1 }
 0x1d2   : > { %p931_p3 = scmp.lt.s32.totalorder %s929_s17, %s925_s26 }
 0x1d3   : > { %p927_p2 = pnand %p926_p0, %p1429_p12 }
 0x1d4   : > { %p932_p6 = por %p931_p3, %p930_p1 }
 0x1d5   : > { %p928_p9 = pneg %p927_p2 }
 0x1d7   : > { %p933_p11 = pnand %p932_p6, %p928_p9 }
 0x1d9   : > { %936 = shalt.err (!%p933_p11)
}
 0x1da   : > { %s988_s29 = smov 128   ;;  %s989_s2 = smov 8  }
 0x1db   : > { %828 = dma.vmem_to_hbm [thread:$0]  (%p1429_p12), %s1372_s11, 1024, %s1370_s16, %s719_s10, %s988_s29, %s988_s29, %s989_s2  }
 0x1dc PF: > { %s748_s3 = sand.u32 1, %s963_s6   ;;  %p1430_p13 = scmp.ne.s32.totalorder %s1426_s19, 0 }
 0x1dd   : > { %p1431_p4 = scmp.ge.s32.totalorder %s975_s9, 2  ;;  %s749_s4 = scalar_lea.sflag [#allocation6], %s748_s3 }
 0x1df   : > { %p835_p5 = pnand %p1431_p4, %p1430_p13 }
 0x1e1   : > { %p836_p7 = pneg %p835_p5 }
 0x1e3   : > { %958 = dma.done.wait (%p836_p7), %s749_s4, 1024  }
 0x1e4   : > { %960 = vsyncadd (%p836_p7), %s749_s4, 4294966272  ;;  %p14_p8 = scmp.ge.s32.totalorder %s1025_s12, 4   ;;  %s1432_s6 = smov %s967_s7 }
 0x1e5   : > { %s1433_s7 = smov %s971_s8  ;;  %s1434_s8 = smov %s1037_s15 }
 0x1e6   : > { %s1435_s9 = smov %s1025_s12  ;;  %16 = sbr.rel (!%p14_p8) target bundleno = 5 (0x5), region = 69 }
 0x1eb   :  { %754 = vsyncpa [#allocation5], 1 }
 0x1ec   :  { %756 = vsyncpa [#allocation5 + $0x1], 1 }
 0x1ed   :  { %757 = vsyncpa [#allocation6], 1 }
 0x1ee   :  { %759 = vsyncpa [#allocation6 + $0x1], 1 }

</bundles_post_ra>
